<compile_context>
chip_gen: v7x
topology: tpu7x:2x2x1
jax: 0.10.0
libtpu: 0.0.40
codegen_flags: <defaults>
</compile_context>

<pallas_src>
import numpy as np
import jax
import jax.numpy as jnp
from jax import lax
from jax.experimental import pallas as pl
from jax.experimental.pallas import tpu as pltpu


# ---------------------------------------------------------------------------
# VMEM budget (generation aware)
# ---------------------------------------------------------------------------
_VMEM_LIMIT_CACHE = None


def _vmem_limit_bytes():
    """~3/4 of physical VMEM: 96 MiB on v5e/v6e (128 MiB), 48 MiB on v7x (64 MiB)."""
    global _VMEM_LIMIT_CACHE
    if _VMEM_LIMIT_CACHE is None:
        try:
            cap = int(pltpu.get_tpu_info().vmem_capacity_bytes)
            _VMEM_LIMIT_CACHE = max(32 << 20, min((cap * 3) // 4, 100 << 20))
        except Exception:
            _VMEM_LIMIT_CACHE = 48 << 20
    return _VMEM_LIMIT_CACHE


# ---------------------------------------------------------------------------
# In-kernel helpers (operate on VMEM values)
# ---------------------------------------------------------------------------
def _im2col_3x3(x):
    """x: (H, W, C) bf16 -> (H*W, 9*C) bf16 im2col with an in-VMEM zero halo.

    No HBM pad pass; the 1-pixel halo and the 9 shifted taps are built in
    bf16 directly so the padded buffer and the im2col are half the size they
    were in f32.  The trailing reshape keeps the lane dim (9*C) unchanged.
    """
    H, W, C = x.shape
    zr = jnp.zeros((1, W, C), x.dtype)
    xp = jnp.concatenate([zr, x, zr], axis=0)                # (H+2, W,   C)
    zc = jnp.zeros((H + 2, 1, C), x.dtype)
    xp = jnp.concatenate([zc, xp, zc], axis=1)               # (H+2, W+2, C)
    taps = [xp[dy:dy + H, dx:dx + W, :] for dy in range(3) for dx in range(3)]
    return jnp.concatenate(taps, axis=-1).reshape(H * W, 9 * C)


def _conv3x3_bn_relu_2d(x, w, scale, bias):
    """Fused 3x3 conv (pad=1) + folded BN + ReLU.

    x:     (H, W, Cin) bf16
    w:     (9*Cin, Cout) bf16, tap-major (kh, kw, cin)
    scale: (1, Cout) f32     bias: (1, Cout) f32
    returns (H*W, Cout) f32
    """
    xcol = _im2col_3x3(x)                                    # (H*W, 9*Cin) bf16
    y = jnp.dot(xcol, w, preferred_element_type=jnp.float32)
    return jnp.maximum(y * scale + bias, 0.0)


def _lerp_up_axis0(x):
    """Bilinear x2 (align_corners=True) along axis 0 of (H, W, C) f32, VPU only."""
    n = x.shape[0]
    denom = float(2 * n - 1)
    k = lax.broadcasted_iota(jnp.int32, (n, 1, 1), 0).astype(jnp.float32)
    we = k / denom                      # even output 2k:   we*x[k-1] + (1-we)*x[k]
    wo = (n - 1 - k) / denom            # odd  output 2k+1: (1-wo)*x[k] + wo*x[k+1]
    xm1 = jnp.concatenate([x[:1], x[:-1]], axis=0)
    xp1 = jnp.concatenate([x[1:], x[-1:]], axis=0)
    even = we * xm1 + (1.0 - we) * x
    odd = (1.0 - wo) * x + wo * xp1
    out = jnp.concatenate([even[:, None], odd[:, None]], axis=1)   # (n, 2, W, C)
    return out.reshape(2 * n, x.shape[1], x.shape[2])


def _lerp_up_axis1(x):
    """Bilinear x2 (align_corners=True) along axis 1 of (H, W, C) f32, VPU only."""
    n = x.shape[1]
    denom = float(2 * n - 1)
    k = lax.broadcasted_iota(jnp.int32, (1, n, 1), 1).astype(jnp.float32)
    we = k / denom
    wo = (n - 1 - k) / denom
    xm1 = jnp.concatenate([x[:, :1], x[:, :-1]], axis=1)
    xp1 = jnp.concatenate([x[:, 1:], x[:, -1:]], axis=1)
    even = we * xm1 + (1.0 - we) * x
    odd = (1.0 - wo) * x + wo * xp1
    out = jnp.concatenate([even[:, :, None], odd[:, :, None]], axis=2)  # (H, n, 2, C)
    return out.reshape(x.shape[0], 2 * n, x.shape[2])


def _upsample2x_bilinear(x):
    """UpsamplingBilinear2d(scale_factor=2) on (H, W, C) f32 -> (2H, 2W, C) f32.

    Formulated as shifted-slice lerps + even/odd interleaves: no MXU, no
    transposes, overlaps with the conv matmuls on the VPU/XLU slots.
    """
    return _lerp_up_axis1(_lerp_up_axis0(x))


# ---------------------------------------------------------------------------
# Kernels
# ---------------------------------------------------------------------------
def _head_conv_kernel(x_ref, w_ref, s_ref, b_ref, o_ref):
    """conv_more: one batch element, full Cout (weight slab resident).

    x_ref: (1, H, W, Cin) bf16   w_ref: (9*Cin, Cout) bf16
    s_ref/b_ref: (1, Cout) f32   o_ref: (1, H, W, Cout) bf16
    """
    x = x_ref[0]
    H, W = x.shape[0], x.shape[1]
    y = _conv3x3_bn_relu_2d(x, w_ref[...], s_ref[...], b_ref[...])
    o_ref[0] = y.reshape(H, W, -1).astype(o_ref.dtype)


def _make_decoder_block_kernel(has_skip, nchw_out):
    """Fused: bilinear 2x upsample (+skip concat) + conv1 + conv2, per batch."""

    def kernel(*refs):
        if has_skip:
            (x_ref, skip_ref, w1_ref, s1_ref, b1_ref,
             w2_ref, s2_ref, b2_ref, o_ref) = refs
        else:
            (x_ref, w1_ref, s1_ref, b1_ref,
             w2_ref, s2_ref, b2_ref, o_ref) = refs
            skip_ref = None

        # UpsamplingBilinear2d(scale=2, align_corners=True): f32 for accuracy,
        # cast to bf16 once before the conv pipeline.
        x = x_ref[0].astype(jnp.float32)                    # (H, W, Cin)
        u = _upsample2x_bilinear(x).astype(jnp.bfloat16)    # (2H, 2W, Cin)
        if skip_ref is not None:
            u = jnp.concatenate([u, skip_ref[0]], axis=-1)
        th, tw = u.shape[0], u.shape[1]

        # conv1 + BN + ReLU: the 4x-upsampled tensor and this intermediate
        # never touch HBM.
        h1 = _conv3x3_bn_relu_2d(u, w1_ref[...], s1_ref[...], b1_ref[...])
        h1 = h1.reshape(th, tw, -1).astype(jnp.bfloat16)

        # conv2 + BN + ReLU.
        xcol2 = _im2col_3x3(h1)                             # (2H*2W, 9*Cout) bf16
        if nchw_out:
            # Final block: NT matmul (w2 passed pre-transposed as (Cout, 9*Cin2))
            # yields a channel-major (Cout, 2H*2W) result directly -> lane-dense
            # f32 store and the module's NCHW output with zero extra passes.
            y = lax.dot_general(w2_ref[...], xcol2, (((1,), (1,)), ((), ())),
                                preferred_element_type=jnp.float32)
            y = jnp.maximum(y * s2_ref[...] + b2_ref[...], 0.0)
            o_ref[0] = y.astype(o_ref.dtype)                # (Cout, 2H*2W)
        else:
            y = jnp.dot(xcol2, w2_ref[...], preferred_element_type=jnp.float32)
            y = jnp.maximum(y * s2_ref[...] + b2_ref[...], 0.0)
            o_ref[0] = y.reshape(th, tw, -1).astype(o_ref.dtype)

    return kernel


# ---------------------------------------------------------------------------
# Parameter folding helpers
# ---------------------------------------------------------------------------
def _fold_bn(p, eps=1e-5):
    # TODO(synk): BatchNorm2d is folded in eval mode (running stats);
    # training-mode batch statistics are not reproduced.
    scale = p["gamma"] / jnp.sqrt(p["var"] + eps)
    bias = p["beta"] - p["mean"] * scale
    return scale, bias


def _flatten_conv_weight(w):
    """(Cout, Cin, 3, 3) PyTorch layout -> (9*Cin, Cout) bf16, tap-major."""
    cout, cin = w.shape[0], w.shape[1]
    return jnp.transpose(w, (2, 3, 1, 0)).reshape(9 * cin, cout).astype(jnp.bfloat16)


def _flatten_conv_weight_t(w):
    """(Cout, Cin, 3, 3) -> (Cout, 9*Cin) bf16, tap-major (for the NT matmul)."""
    cout, cin = w.shape[0], w.shape[1]
    return jnp.transpose(w, (0, 2, 3, 1)).reshape(cout, 9 * cin).astype(jnp.bfloat16)


# ---------------------------------------------------------------------------
# Wrappers
# ---------------------------------------------------------------------------
def conv_more(x, p, eps=1e-5):
    """Head Conv2dReLU: x (B, H, W, Cin) NHWC -> (B, H, W, Cout) bf16.

    Full (9*Cin, Cout) weight slab resident -> im2col built once per image,
    single matmul with N=Cout=512 (2x 256-wide MXU tiles, no rebuilds).
    """
    x = x.astype(jnp.bfloat16)
    B, H, W, Cin = x.shape
    Cout = p["w"].shape[0]
    scale, bias = _fold_bn(p, eps)
    wk = _flatten_conv_weight(p["w"])
    return pl.pallas_call(
        _head_conv_kernel,
        out_shape=jax.ShapeDtypeStruct((B, H, W, Cout), jnp.bfloat16),
        grid=(B,),
        in_specs=[
            pl.BlockSpec((1, H, W, Cin), lambda b: (b, 0, 0, 0)),
            pl.BlockSpec((9 * Cin, Cout), lambda b: (0, 0)),
            pl.BlockSpec((1, Cout), lambda b: (0, 0)),
            pl.BlockSpec((1, Cout), lambda b: (0, 0)),
        ],
        out_specs=pl.BlockSpec((1, H, W, Cout), lambda b: (b, 0, 0, 0)),
        compiler_params=pltpu.CompilerParams(
            dimension_semantics=("parallel",),
            vmem_limit_bytes=_vmem_limit_bytes()),
    )(x, wk, scale.reshape(1, Cout), bias.reshape(1, Cout))


def decoder_block(x, blk, skip=None, eps=1e-5, nchw_out=False):
    """Fused DecoderBlock.

    x (B, H, W, Cin) NHWC bf16 ->
      nchw_out=False: (B, 2H, 2W, Cout) bf16 (feeds the next block)
      nchw_out=True : (B, Cout, 2H*2W) f32  (final block, channel-major,
                       lane-dense store; caller just reshapes to NCHW)
    """
    x = x.astype(jnp.bfloat16)
    B, H, W, Cin = x.shape
    assert H == W, "DecoderCup uses square feature maps (h = w = sqrt(n_patch))"
    Cout = blk["conv1"]["w"].shape[0]
    c1_in = blk["conv1"]["w"].shape[1]
    TH, TW = 2 * H, 2 * W
    s1, b1 = _fold_bn(blk["conv1"], eps)
    s2, b2 = _fold_bn(blk["conv2"], eps)
    w1 = _flatten_conv_weight(blk["conv1"]["w"])             # (9*c1_in, Cout)

    in_arrays = [x]
    in_specs = [pl.BlockSpec((1, H, W, Cin), lambda b: (b, 0, 0, 0))]
    if skip is not None:
        skip = skip.astype(jnp.bfloat16)
        Csk = skip.shape[-1]
        assert c1_in == Cin + Csk
        in_arrays.append(skip)
        in_specs.append(pl.BlockSpec((1, TH, TW, Csk), lambda b: (b, 0, 0, 0)))
    else:
        assert c1_in == Cin

    if nchw_out:
        w2 = _flatten_conv_weight_t(blk["conv2"]["w"])       # (Cout, 9*Cout)
        s2a, b2a = s2.reshape(Cout, 1), b2.reshape(Cout, 1)
        w2_spec = pl.BlockSpec((Cout, 9 * Cout), lambda b: (0, 0))
        sb2_spec = pl.BlockSpec((Cout, 1), lambda b: (0, 0))
        out_shape = jax.ShapeDtypeStruct((B, Cout, TH * TW), jnp.float32)
        out_spec = pl.BlockSpec((1, Cout, TH * TW), lambda b: (b, 0, 0))
    else:
        w2 = _flatten_conv_weight(blk["conv2"]["w"])         # (9*Cout, Cout)
        s2a, b2a = s2.reshape(1, Cout), b2.reshape(1, Cout)
        w2_spec = pl.BlockSpec((9 * Cout, Cout), lambda b: (0, 0))
        sb2_spec = pl.BlockSpec((1, Cout), lambda b: (0, 0))
        out_shape = jax.ShapeDtypeStruct((B, TH, TW, Cout), jnp.bfloat16)
        out_spec = pl.BlockSpec((1, TH, TW, Cout), lambda b: (b, 0, 0, 0))

    in_arrays += [w1, s1.reshape(1, Cout), b1.reshape(1, Cout), w2, s2a, b2a]
    in_specs += [
        pl.BlockSpec((9 * c1_in, Cout), lambda b: (0, 0)),
        pl.BlockSpec((1, Cout), lambda b: (0, 0)),
        pl.BlockSpec((1, Cout), lambda b: (0, 0)),
        w2_spec, sb2_spec, sb2_spec,
    ]

    return pl.pallas_call(
        _make_decoder_block_kernel(skip is not None, nchw_out),
        out_shape=out_shape,
        grid=(B,),
        in_specs=in_specs,
        out_specs=out_spec,
        compiler_params=pltpu.CompilerParams(
            dimension_semantics=("parallel",),
            vmem_limit_bytes=_vmem_limit_bytes()),
    )(*in_arrays)


# ---------------------------------------------------------------------------
# Parameter init (deterministic, synthetic)
# ---------------------------------------------------------------------------
def init_conv_bn(key, cin, cout):
    kw, kg, kb, km, kv = jax.random.split(key, 5)
    w = jax.random.normal(kw, (cout, cin, 3, 3), jnp.float32) / np.sqrt(9.0 * cin)
    gamma = 1.0 + 0.1 * jax.random.normal(kg, (cout,), jnp.float32)
    beta = 0.1 * jax.random.normal(kb, (cout,), jnp.float32)
    mean = 0.1 * jax.random.normal(km, (cout,), jnp.float32)
    var = 0.9 + 0.1 * jnp.abs(jax.random.normal(kv, (cout,), jnp.float32))
    return {"w": w, "gamma": gamma, "beta": beta, "mean": mean, "var": var}


def init_decoder_cup(key, hidden_size, decoder_channels, head_channels=512):
    n_blocks = len(decoder_channels)
    keys = jax.random.split(key, 1 + 2 * n_blocks)
    params = {"conv_more": init_conv_bn(keys[0], hidden_size, head_channels)}
    in_channels = [head_channels] + list(decoder_channels[:-1])
    blocks = []
    ki = 1
    for cin, cout in zip(in_channels, decoder_channels):
        conv1 = init_conv_bn(keys[ki], cin, cout)            # skip_channels == 0
        conv2 = init_conv_bn(keys[ki + 1], cout, cout)
        ki += 2
        blocks.append({"conv1": conv1, "conv2": conv2})
    params["blocks"] = blocks
    return params


# ---------------------------------------------------------------------------
# DecoderCup forward
# ---------------------------------------------------------------------------
def decoder_cup_forward(params, hidden_states, features=None, n_skip=0):
    """hidden_states: (B, n_patch, hidden) -> (B, C_out, 16*h, 16*w) NCHW f32."""
    B, n_patch, hidden = hidden_states.shape
    h = w = int(np.sqrt(n_patch))
    # permute(0,2,1).view(B, hidden, h, w) in NCHW == this reshape in NHWC.
    x = hidden_states.reshape(B, h, w, hidden).astype(jnp.bfloat16)
    x = conv_more(x, params["conv_more"])
    n_blocks = len(params["blocks"])
    for i, blk in enumerate(params["blocks"]):
        skip = None
        if features is not None and i < n_skip:
            # Backbone features are NCHW: one trace-time relayout to NHWC bf16.
            # TODO(synk): move this relayout in-VMEM to save the extra HBM pass.
            skip = jnp.transpose(features[i], (0, 2, 3, 1)).astype(jnp.bfloat16)
        x = decoder_block(x, blk, skip=skip, nchw_out=(i == n_blocks - 1))
    # Last block already wrote channel-major (B, Cout, 4*H*W) f32 -> free reshape.
    c_last = params["blocks"][-1]["conv1"]["w"].shape[0]
    hw = h * (2 ** n_blocks)
    return x.reshape(B, c_last, hw, hw)


# ---------------------------------------------------------------------------
if __name__ == "__main__":
    key = jax.random.PRNGKey(0)

    # Small synthetic config: hidden_size=32, decoder_channels=(64,32,16,8),
    # n_skip=0 (skip_channels=[0,0,0,0], features=None), head_channels=512.
    B, n_patch, hidden_size = 2, 16, 32
    decoder_channels = (64, 32, 16, 8)

    params = init_decoder_cup(key, hidden_size, decoder_channels)
    hidden_states = jax.random.normal(
        jax.random.fold_in(key, 123), (B, n_patch, hidden_size), jnp.float32)

    out = decoder_cup_forward(params, hidden_states, features=None, n_skip=0)
    out = jax.block_until_ready(out)

    hw = int(np.sqrt(n_patch)) * (2 ** len(decoder_channels))   # 4 -> 64
    assert out.shape == (B, decoder_channels[-1], hw, hw), out.shape
    assert out.dtype == jnp.float32
    assert bool(jnp.all(jnp.isfinite(out)))
    print("KERNEL_OK")
</pallas_src>

<mosaic_0001>
module attributes {stable_mosaic.version = 11 : i64} {
  func.func @_head_conv_kernel(%arg0: i32, %arg1: memref<1x4x4x32xbf16, #tpu.memory_space<vmem>>, %arg2: memref<288x512xbf16, #tpu.memory_space<vmem>>, %arg3: memref<1x512xf32, #tpu.memory_space<vmem>>, %arg4: memref<1x512xf32, #tpu.memory_space<vmem>>, %arg5: memref<1x4x4x512xbf16, #tpu.memory_space<vmem>>) attributes {dimension_semantics = [#tpu.dimension_semantics<parallel>], iteration_bounds = array<i64: 2>, scalar_prefetch = 0 : i64, scratch_operands = 0 : i64, tpu.core_type = #tpu.core_type<tc>, window_params = [{transform_indices = @transform_0, window_bounds = array<i64: 1, 4, 4, 32>}, {pipeline_mode = #tpu.pipeline_mode<synchronous>, transform_indices = @transform_1, window_bounds = array<i64: 288, 512>}, {pipeline_mode = #tpu.pipeline_mode<synchronous>, transform_indices = @transform_2, window_bounds = array<i64: 1, 512>}, {pipeline_mode = #tpu.pipeline_mode<synchronous>, transform_indices = @transform_3, window_bounds = array<i64: 1, 512>}, {transform_indices = @transform_4, window_bounds = array<i64: 1, 4, 4, 512>}]} {
    %c0 = arith.constant 0 : index
    %c0_0 = arith.constant 0 : index
    %c0_1 = arith.constant 0 : index
    %c0_2 = arith.constant 0 : index
    %0 = vector.load %arg1[%c0, %c0_0, %c0_1, %c0_2] : memref<1x4x4x32xbf16, #tpu.memory_space<vmem>>, vector<1x4x4x32xbf16>
    %1 = vector.shape_cast %0 : vector<1x4x4x32xbf16> to vector<4x4x32xbf16>
    %c0_3 = arith.constant 0 : index
    %c0_4 = arith.constant 0 : index
    %2 = vector.load %arg2[%c0_3, %c0_4] : memref<288x512xbf16, #tpu.memory_space<vmem>>, vector<288x512xbf16>
    %c0_5 = arith.constant 0 : index
    %c0_6 = arith.constant 0 : index
    %3 = vector.load %arg3[%c0_5, %c0_6] : memref<1x512xf32, #tpu.memory_space<vmem>>, vector<1x512xf32>
    %c0_7 = arith.constant 0 : index
    %c0_8 = arith.constant 0 : index
    %4 = vector.load %arg4[%c0_7, %c0_8] : memref<1x512xf32, #tpu.memory_space<vmem>>, vector<1x512xf32>
    %cst = arith.constant 0.000000e+00 : bf16
    %5 = vector.broadcast %cst : bf16 to vector<1x4x32xbf16>
    %6 = tpu.concatenate %5, %1, %5 in 0 : vector<1x4x32xbf16>, vector<4x4x32xbf16>, vector<1x4x32xbf16> -> vector<6x4x32xbf16>
    %cst_9 = arith.constant 0.000000e+00 : bf16
    %7 = vector.broadcast %cst_9 : bf16 to vector<6x1x32xbf16>
    %8 = tpu.concatenate %7, %6, %7 in 1 : vector<6x1x32xbf16>, vector<6x4x32xbf16>, vector<6x1x32xbf16> -> vector<6x6x32xbf16>
    %9 = vector.extract_strided_slice %8 {offsets = [0, 0, 0], sizes = [4, 4, 32], strides = [1, 1, 1]} : vector<6x6x32xbf16> to vector<4x4x32xbf16>
    %10 = vector.extract_strided_slice %8 {offsets = [0, 1, 0], sizes = [4, 4, 32], strides = [1, 1, 1]} : vector<6x6x32xbf16> to vector<4x4x32xbf16>
    %11 = vector.extract_strided_slice %8 {offsets = [0, 2, 0], sizes = [4, 4, 32], strides = [1, 1, 1]} : vector<6x6x32xbf16> to vector<4x4x32xbf16>
    %12 = vector.extract_strided_slice %8 {offsets = [1, 0, 0], sizes = [4, 4, 32], strides = [1, 1, 1]} : vector<6x6x32xbf16> to vector<4x4x32xbf16>
    %13 = vector.extract_strided_slice %8 {offsets = [1, 1, 0], sizes = [4, 4, 32], strides = [1, 1, 1]} : vector<6x6x32xbf16> to vector<4x4x32xbf16>
    %14 = vector.extract_strided_slice %8 {offsets = [1, 2, 0], sizes = [4, 4, 32], strides = [1, 1, 1]} : vector<6x6x32xbf16> to vector<4x4x32xbf16>
    %15 = vector.extract_strided_slice %8 {offsets = [2, 0, 0], sizes = [4, 4, 32], strides = [1, 1, 1]} : vector<6x6x32xbf16> to vector<4x4x32xbf16>
    %16 = vector.extract_strided_slice %8 {offsets = [2, 1, 0], sizes = [4, 4, 32], strides = [1, 1, 1]} : vector<6x6x32xbf16> to vector<4x4x32xbf16>
    %17 = vector.extract_strided_slice %8 {offsets = [2, 2, 0], sizes = [4, 4, 32], strides = [1, 1, 1]} : vector<6x6x32xbf16> to vector<4x4x32xbf16>
    %18 = tpu.concatenate %9, %10, %11, %12, %13, %14, %15, %16, %17 in 2 : vector<4x4x32xbf16>, vector<4x4x32xbf16>, vector<4x4x32xbf16>, vector<4x4x32xbf16>, vector<4x4x32xbf16>, vector<4x4x32xbf16>, vector<4x4x32xbf16>, vector<4x4x32xbf16>, vector<4x4x32xbf16> -> vector<4x4x288xbf16>
    %19 = vector.shape_cast %18 : vector<4x4x288xbf16> to vector<16x288xbf16>
    %cst_10 = arith.constant dense<0.000000e+00> : vector<16x512xf32>
    %20 = tpu.matmul %19, %2, %cst_10 {dimension_numbers = #tpu.dot_dimension_numbers<[1], [0], [0], [1], [0, 0, 1, 1], [], []>} : vector<16x288xbf16>, vector<288x512xbf16>, vector<16x512xf32> -> vector<16x512xf32>
    %21 = vector.broadcast %3 : vector<1x512xf32> to vector<16x512xf32>
    %22 = arith.mulf %20, %21 : vector<16x512xf32>
    %23 = vector.broadcast %4 : vector<1x512xf32> to vector<16x512xf32>
    %24 = arith.addf %22, %23 : vector<16x512xf32>
    %cst_11 = arith.constant 0.000000e+00 : f32
    %25 = vector.broadcast %cst_11 : f32 to vector<16x512xf32>
    %26 = arith.maximumf %24, %25 : vector<16x512xf32>
    %27 = vector.shape_cast %26 : vector<16x512xf32> to vector<4x4x512xf32>
    %28 = arith.truncf %27 : vector<4x4x512xf32> to vector<4x4x512xbf16>
    %c0_12 = arith.constant 0 : index
    %c0_13 = arith.constant 0 : index
    %c0_14 = arith.constant 0 : index
    %c0_15 = arith.constant 0 : index
    %29 = vector.load %arg5[%c0_12, %c0_13, %c0_14, %c0_15] : memref<1x4x4x512xbf16, #tpu.memory_space<vmem>>, vector<1x4x4x512xbf16>
    %30 = vector.shape_cast %29 : vector<1x4x4x512xbf16> to vector<4x4x512xbf16>
    %31 = vector.shape_cast %28 : vector<4x4x512xbf16> to vector<1x4x4x512xbf16>
    tpu.vector_store %arg5[%c0_12, %c0_13, %c0_14, %c0_15], %31 {strides = array<i32>} : memref<1x4x4x512xbf16, #tpu.memory_space<vmem>>, vector<1x4x4x512xbf16>,
    return
  }
  func.func @transform_0(%arg0: i32) -> (i32, i32, i32, i32) {
    %c0_i32 = arith.constant 0 : i32
    %c0_i32_0 = arith.constant 0 : i32
    %c0_i32_1 = arith.constant 0 : i32
    %c0_i32_2 = arith.constant 0 : i32
    return %arg0, %c0_i32, %c0_i32_0, %c0_i32_1 : i32, i32, i32, i32
  }
  func.func @transform_1(%arg0: i32) -> (i32, i32) {
    %c0_i32 = arith.constant 0 : i32
    %c0_i32_0 = arith.constant 0 : i32
    %c0_i32_1 = arith.constant 0 : i32
    return %c0_i32, %c0_i32_0 : i32, i32
  }
  func.func @transform_2(%arg0: i32) -> (i32, i32) {
    %c0_i32 = arith.constant 0 : i32
    %c0_i32_0 = arith.constant 0 : i32
    %c0_i32_1 = arith.constant 0 : i32
    return %c0_i32, %c0_i32_0 : i32, i32
  }
  func.func @transform_3(%arg0: i32) -> (i32, i32) {
    %c0_i32 = arith.constant 0 : i32
    %c0_i32_0 = arith.constant 0 : i32
    %c0_i32_1 = arith.constant 0 : i32
    return %c0_i32, %c0_i32_0 : i32, i32
  }
  func.func @transform_4(%arg0: i32) -> (i32, i32, i32, i32) {
    %c0_i32 = arith.constant 0 : i32
    %c0_i32_0 = arith.constant 0 : i32
    %c0_i32_1 = arith.constant 0 : i32
    %c0_i32_2 = arith.constant 0 : i32
    return %arg0, %c0_i32, %c0_i32_0, %c0_i32_1 : i32, i32, i32, i32
  }
}

</mosaic_0001>

<bundles_post_ra>
// kernel: tpu_custom_call.1
= control target key start
LH: loop header
LB: loop body
LE: loop exit
PB: predicated region body
PF: predicated region fallthrough
CT: control target
= control target key end

     0   :  { %9 = vsyncpa [#allocation3], 0  ;;  %s2337_s0 = inlined_call_operand.hbm [shape: bf16[2,4,4,32], index: 0, kind: input, shape index: {}]   ;;  %s2338_s1 = inlined_call_operand.hbm [shape: bf16[288,512], index: 1, kind: input, shape index: {}]   ;;  %s2339_s2 = inlined_call_operand.vmem [shape: f32[1,512], index: 2, kind: input, shape index: {}]   ;;  %s2340_s3 = inlined_call_operand.vmem [shape: f32[1,512], index: 3, kind: input, shape index: {}]   ;;  %s2341_s4 = inlined_call_operand.hbm [shape: bf16[2,4,4,512], index: 4, kind: output, shape index: {}]  }
   0x1   :  { %11 = vsyncpa [#allocation3 + $0x1], 0 }
   0x2   :  { %12 = vsyncpa [#allocation6], 0 }
   0x3   :  { %13 = vsyncpa [#allocation4], 0 }
   0x4   :  { %15 = vsyncpa [#allocation4 + $0x1], 0  ;;  %s1939_s15 = smov 0   ;;  %s1941_s16 = smov 0  }
   0x5   :  { %s1943_s17 = smov 0   ;;  %s1945_s18 = smov 0  }
   0x6 LB: > { %s1960_s19 = sadd.s32 4294967295, %s1898_s18   ;;  %s1469_s20 = sadd.s32 4294967294, %s1898_s18   ;;  %s1898_s18 = sphi %s1945_s18, %s2365_s18   ;;  %s1894_s17 = sphi %s1943_s17, %s2364_s17   ;;  %s1890_s16 = sphi %s1941_s16, %s2363_s16   ;;  %s1886_s15 = sphi %s1939_s15, %s2362_s15  }
   0x7   : > { %p41_p0 = scmp.ne.s32.totalorder %s1890_s16, %s1886_s15  ;;  %p2342_p1 = scmp.eq.s32.totalorder %s1960_s19, 0 }
   0x8   : > { %p134_p3 = scmp.eq.s32.totalorder %s1469_s20, 1  ;;  %p1470_p5 = scmp.ge.s32.totalorder %s1898_s18, 1 }
   0x9   : > { %p1969_p4 = por %p2342_p1, %p41_p0  ;;  %p141_p7 = scmp.lt.s32.totalorder %s1898_s18, 3 }
   0xa   : > { %p1974_p6 = por %p134_p3, %p41_p0  ;;  %s1900_s24 = smov [#allocation5]  }
   0xb   : > { %s2345_s21 = scalar_select %p1969_p4, 1, 0 }
   0xc   : > { %s2346_s22 = scalar_select %p1974_p6, 1, 0 }
   0xd   : > { %p1979_p8 = pnand %p1470_p5, %p141_p7  ;;  %s153_s25 = sshll.u32 %s1900_s24, 4  ;;  %s1983_s25 = int_to_ptr.vmem [resolvable:$true] %s153_s25 }
   0xe   : > { %s1995_s27 = sadd.s32 1, %s1898_s18   ;;  %s28_s28 = sadd.s32 1, %s1894_s17 }
   0xf   : > { %s2347_s23 = scalar_select %p1979_p8, 1, 0 }
  0x10   : > { %p1597_p9 = pneg %p1979_p8  ;;  %s25_s29 = ssub.s32 %s1898_s18, %s1995_s27 }
  0x11   : > { %s1770_s6 = scalar_lea.hbm %s2338_s1, 9216 }
  0x12   : > { %p1990_p11 = pnand %p1597_p9, %p2342_p1  ;;  %p1771_p12 = scmp.ne.s32.totalorder %s2338_s1, %s1770_s6 }
  0x13   : > { %p1777_p5 = scmp.lt.u32.totalorder %s1770_s6, %s2338_s1 }
  0x14   : > { %p1772_p13 = pneg %p1990_p11 }
  0x16   : > { %p1773_p0 = pnand %p1772_p13, %p1771_p12 }
  0x18   : > { %p1774_p3 = pneg %p1773_p0 }
  0x1a   : > { %p1779_p7 = pnand %p1777_p5, %p1774_p3 }
  0x1c   : > { %1782 = shalt.err (!%p1779_p7)
}
  0x1d   : > { %s1783_s11 = scalar_lea.vmem %s1983_s25, 9216  ;;  %p1791_p2 = scmp.lt.s32.totalorder %s1983_s25, %s1983_s25 }
  0x1e   : > { %p1784_p9 = scmp.ne.s32.totalorder %s1983_s25, %s1783_s11  ;;  %p1792_p6 = scmp.lt.s32.totalorder %s1783_s11, %s1783_s11 }
  0x20   : > { %p1786_p10 = pnand %p1784_p9, %p1772_p13  ;;  %p1793_p4 = por %p1792_p6, %p1791_p2 }
  0x22   : > { %p1787_p1 = pneg %p1786_p10 }
  0x24   : > { %p1794_p8 = pnand %p1793_p4, %p1787_p1 }
  0x26   : > { %1797 = shalt.err (!%p1794_p8)
}
  0x27   : > { %s1901_s12 = smov 256   ;;  %s1902_s13 = smov 16  }
  0x28   : > { %1600 = dma.hbm_to_vmem [thread:$0]  (!%p1990_p11), %s2338_s1, 9216, %s1983_s25, [#allocation6], %s1901_s12, %s1901_s12, %s1902_s13  }
  0x29   : > { %p26_p2 = scmp.eq.s32.totalorder %s25_s29, 0  ;;  %p35_p1 = scmp.ne.s32.totalorder %s1894_s17, %s1890_s16 }
  0x2a   : > { %p36_p4 = scmp.eq.s32.totalorder %s1898_s18, 0  ;;  %p1610_p6 = scmp.lt.s32.totalorder %s1898_s18, 2 }
  0x2b   : > { %s2026_s24 = scalar_select %p26_p2, %s1894_s17, %s28_s28  }
  0x2c   : > { %p37_p8 = por %p36_p4, %p35_p1  ;;  %p2349_p10 = scmp.eq.s32.totalorder %s1960_s19, 1 }
  0x2d   : > { %s173_s5 = sand.u32 1, %s1894_s17   ;;  %s1579_s6 = sshll.u32 %s1898_s18, 7 }
  0x2e   : > { %p2030_p12 = por %p2349_p10, %p35_p1  ;;  %s1473_s7 = sshll.u32 %s173_s5, 3 }
  0x2f   : > { %s2039_s9 = scalar_lea.hbm %s2337_s0, %s1579_s6  ;;  %s177_s25 = scalar_lea.vmem [#allocation2], %s1473_s7 }
  0x30   : > { %s184_s28 = sshll.u32 %s177_s25, 4  ;;  %p2041_p11 = pnand %p1610_p6, %p37_p8  ;;  %s2045_s28 = int_to_ptr.vmem [resolvable:$true] %s184_s28 }
  0x31   : > { %s2047_s10 = scalar_lea.sflag [#allocation3], %s173_s5  ;;  %s1798_s11 = scalar_lea.hbm %s2039_s9, 128 }
  0x32   : > { %p1799_p13 = scmp.ne.s32.totalorder %s2039_s9, %s1798_s11  ;;  %p1800_p0 = pneg %p2041_p11 }
  0x33   : > { %s1803_s14 = scalar_lea.hbm %s2337_s0, 256  ;;  %p1804_p7 = scmp.lt.u32.totalorder %s2039_s9, %s2337_s0 }
  0x34   : > { %p1801_p3 = pnand %p1800_p0, %p1799_p13  ;;  %p1805_p9 = scmp.lt.u32.totalorder %s1803_s14, %s1798_s11 }
  0x35   : > { %p1807_p1 = scmp.lt.u32.totalorder %s1798_s11, %s2039_s9 }
  0x36   : > { %p1802_p5 = pneg %p1801_p3  ;;  %p1806_p2 = por %p1805_p9, %p1804_p7 }
  0x38   : > { %p1808_p4 = por %p1807_p1, %p1806_p2 }
  0x3a   : > { %p1809_p6 = pnand %p1808_p4, %p1802_p5 }
  0x3c   : > { %1812 = shalt.err (!%p1809_p6)
}
  0x3d   : > { %s1813_s5 = scalar_lea.vmem %s2045_s28, 128  ;;  %s1903_s7 = smov [#allocation2]  }
  0x3e   : > { %p1814_p8 = scmp.ne.s32.totalorder %s2045_s28, %s1813_s5  ;;  %s1818_s26 = sshll.u32 %s1903_s7, 4  ;;  %s1819_s26 = int_to_ptr.vmem [resolvable:$false] %s1818_s26 }
  0x3f   : > { %s1820_s8 = scalar_lea.vmem %s1819_s26, 256  ;;  %p1821_p3 = scmp.lt.s32.totalorder %s2045_s28, %s1819_s26 }
  0x40   : > { %p1816_p10 = pnand %p1814_p8, %p1800_p0  ;;  %p1822_p7 = scmp.lt.s32.totalorder %s1820_s8, %s1813_s5 }
  0x42   : > { %p1817_p13 = pneg %p1816_p10  ;;  %p1823_p9 = por %p1822_p7, %p1821_p3 }
  0x44   : > { %p1824_p2 = pnand %p1823_p9, %p1817_p13 }
  0x46   : > { %1827 = shalt.err (!%p1824_p2)
}
  0x47   : > { %s1904_s25 = smov 32   ;;  %s1905_s11 = smov 2  }
  0x48   : > { %1604 = dma.hbm_to_vmem [thread:$0]  (!%p2041_p11), %s2039_s9, 128, %s2045_s28, %s2047_s10, %s1904_s25, %s1904_s25, %s1905_s11  }
  0x49   : > { %p2352_p0 = scmp.ne.s32.totalorder %s2347_s23, 0 }
  0x4a   : > { %s2078_s12 = sand.u32 (!%p2352_p0), 1, %s1890_s16   ;;  %p2353_p5 = scmp.ne.s32.totalorder (!%p2352_p0), %s2345_s21, 0 }
  0x4b   : > { %196 = sbr.rel (%p2352_p0) target bundleno = 527 (0x20f), region = 36  ;;  %s1477_s13 = sshll.u32 (!%p2352_p0), %s2078_s12, 3 }
  0x4c   : > { %s199_s14 = scalar_lea.sflag (!%p2352_p0), [#allocation3], %s2078_s12  ;;  %s2082_s20 = scalar_lea.vmem (!%p2352_p0), [#allocation2], %s1477_s13 }
  0x52   : > { %1873 = dma.done.wait (%p2353_p5), %s199_s14, 128  }
  0x53   : > { %1875 = vsyncadd (%p2353_p5), %s199_s14, 4294967168  ;;  %p2354_p11 = scmp.eq.s32.totalorder %s1960_s19, 0 }
  0x55   : > { %1877 = dma.done.wait (%p2354_p11), [#allocation6], 9216   ;;  %p2355_p1 = pmov %p2354_p11 }
  0x56   : > { %vm350_vm0 = vcmask 1040384   ;;  %vm351_vm1 = vsmask.f32 256  ;;  %v1906_v0 = vmov 0   ;;  %vm358_vm3 = vcmask 1042432   ;;  %s1908_s21 = smov 64  }
  0x57   : > { %1879 = vsyncadd (%p2355_p1), [#allocation6], 4294958080  ;;  %v313_v1 = vrot.slane %v1906_v0, 7  ;;  %vm359_vm4 = vsmask.f32 2304  ;;  %v526_v4 = vlaneseq  ;;  %s1909_s23 = smov 32  }
  0x58   : > { %vm2093_vm2 = vmand %vm350_vm0, %vm351_vm1  ;;  %v1907_v11 = vmov 1983009808   ;;  %v233_v15 = vld [vmem:[%s2082_s20 + $0x2] sm:$0x3]  ;;  %v232_v16 = vld [vmem:[%s2082_s20] sm:$0x3] }
  0x59   : > { %vm2097_vm5 = vmand %vm358_vm3, %vm359_vm4  ;;  %v353_v5 = vsel %vm2093_vm2, 0, %v313_v1  ;;  %v2110_v10 = vshrl.u32 %v526_v4, 7  ;;  %v524_v12 = vunpack.c.l.s4 %v1907_v11  ;;  %v325_v17 = vshrl.u32 %v233_v15, 16  ;;  %v235_v21 = vld [vmem:[%s2082_s20 + $0x6] sm:$0x3]  ;;  %s1910_s9 = smov 96  }
  0x5a   : > { %v2105_v6 = vsel %vm2097_vm5, %v353_v5, 0  ;;  %v328_v18 = vshll.u32 %v233_v15, 16  ;;  %v318_v19 = vshrl.u32 %v232_v16, 16  ;;  %v321_v20 = vshll.u32 %v232_v16, 16  ;;  %v234_v25 = vld [vmem:[%s2082_s20 + $0x4] sm:$0x3] }
  0x5b   : > { %v406_v7 = vrot.slane %v2105_v6, 1  ;;  %v367_v8 = vshrl.u32 %v2105_v6, 16  ;;  %v369_v9 = vshll.u32 %v2105_v6, 16  ;;  %v339_v23 = vshrl.u32 %v235_v21, 16  ;;  %v1662_v30 = vld [vmem:[#allocation5 + $0x4] ss:$16 sps:$4 sm:$0xff]  }
  0x5c   : > { %v342_v24 = vshll.u32 %v235_v21, 16  ;;  %v327_v26 = vrot.slane %v325_v17, 7  ;;  %v320_v27 = vrot.slane %v318_v19, 7  ;;  %v332_v28 = vshrl.u32 %v234_v25, 16  ;;  %v1664_v33 = vld [vmem:[#allocation5 + $0xc] ss:$16 sps:$4 sm:$0xff]   ;;  %986 = vmatprep.subr.bf16.mxu0 %v1662_v30 }
  0x5d   : > { %v1657_v13 = vpack.i.bf16 %v2105_v6, %v406_v7  ;;  %v371_v14 = vrot.slane %v369_v9, 1  ;;  %v335_v29 = vshll.u32 %v234_v25, 16  ;;  %v525_v31 = vunpack.c.0.s8 %v524_v12  ;;  %v1666_v34 = vld [vmem:[#allocation5] ss:$16 sps:$4 sm:$0xff]   ;;  %v1667_v38 = vld [vmem:[#allocation5 + $0x8] ss:$16 sps:$4 sm:$0xff]   ;;  %1072 = vmatprep.subr.bf16.mxu1 %v1664_v33 }
  0x5e   : > { %v341_v32 = vrot.slane %v339_v23, 7  ;;  %v330_v35 = vor.u32 %v328_v18, %v327_v26  ;;  %v323_v36 = vor.u32 %v321_v20, %v320_v27  ;;  %v334_v37 = vrot.slane %v332_v28, 7  ;;  %v1668_v40 = vld [vmem:[#allocation5 + $0x24] ss:$16 sps:$4 sm:$0xff]   ;;  %987 = vmatpush1.bf16.msra.mxu0 %v1666_v34  ;;  %1073 = vmatpush1.bf16.msra.mxu1 %v1667_v38  ;;  %v1670_v44 = vld [vmem:[#allocation5 + $0x2c] ss:$16 sps:$4 sm:$0xff]  }
  0x5f   : > { %1658 = vrot.lane.b32.xlu0 %v1657_v13, %s1908_s21  ;;  %v2117_v22 = vor.u32 %v371_v14, %v367_v8  ;;  %v1672_v45 = vld [vmem:[#allocation5 + $0x20] ss:$16 sps:$4 sm:$0xff]   ;;  %v2127_v46 = vsub.s32 %v525_v31, %v2110_v10  ;;  %988 = vmatprep.subr.bf16.mxu0 %v1668_v40  ;;  %v1673_v50 = vld [vmem:[#allocation5 + $0x28] ss:$16 sps:$4 sm:$0xff]   ;;  %v1674_v58 = vld [vmem:[#allocation5 + $0x44] ss:$16 sps:$4 sm:$0xff]  }
  0x60   : > { %v344_v39 = vor.u32 %v342_v24, %v341_v32  ;;  %v355_v41 = vsel %vm2093_vm2, 0, %v330_v35  ;;  %v354_v42 = vsel %vm2093_vm2, 0, %v323_v36  ;;  %v337_v43 = vor.u32 %v335_v29, %v334_v37  ;;  %1074 = vmatprep.subr.bf16.mxu1 %v1670_v44  ;;  %v1676_v62 = vld [vmem:[#allocation5 + $0x4c] ss:$16 sps:$4 sm:$0xff]   ;;  %v1678_v1 = vld [vmem:[#allocation5 + $0x40] ss:$16 sps:$4 sm:$0xff]  }
  0x61   : > { %v2131_v47 = vsel %vm2097_vm5, %v355_v41, 0  ;;  %v2135_v48 = vsel %vm2097_vm5, %v354_v42, 0  ;;  %v2148_v55 = vrot.slane %v406_v7, %v2127_v46  ;;  %v1679_v3 = vld [vmem:[#allocation5 + $0x48] ss:$16 sps:$4 sm:$0xff]   ;;  %v1680_v8 = vld [vmem:[#allocation5 + $0x64] ss:$16 sps:$4 sm:$0xff]  }
  0x62   : > { %v357_v49 = vsel %vm2093_vm2, 0, %v344_v39  ;;  %v408_v51 = vrot.slane %v2131_v47, 1  ;;  %v407_v52 = vrot.slane %v2135_v48, 1  ;;  %v356_v54 = vsel %vm2093_vm2, 0, %v337_v43  ;;  %989 = vmatpush1.bf16.msra.mxu0 %v1672_v45  ;;  %1075 = vmatpush1.bf16.msra.mxu1 %v1673_v50  ;;  %v1682_v12 = vld [vmem:[#allocation5 + $0x6c] ss:$16 sps:$4 sm:$0xff]  }
  0x63   : > { %394 = vrot.lane.b32.xlu0 %v2117_v22, %s1909_s23  ;;  %v2143_v53 = vsel %vm2097_vm5, %v357_v49, 0  ;;  %v2153_v57 = vsel %vm2097_vm5, %v356_v54, 0  ;;  %v376_v61 = vshll.u32 %v2135_v48, 16  ;;  %990 = vmatprep.subr.bf16.mxu0 %v1674_v58  ;;  %v374_v5 = vshrl.u32 %v2135_v48, 16  ;;  %v1684_v13 = vld [vmem:[#allocation5 + $0x60] ss:$16 sps:$4 sm:$0xff]  }
  0x64   : > { %v434_v56 = vrot.slane %v2143_v53, 1  ;;  %437 = vrot.lane.b32.xlu1 %v408_v51, %s1909_s23  ;;  %v536_v59 = vrot.slane %v408_v51, %v2127_v46  ;;  %v409_v60 = vrot.slane %v2153_v57, 1  ;;  %1076 = vmatprep.subr.bf16.mxu1 %v1676_v62  ;;  %v383_v7 = vshll.u32 %v2131_v47, 16  ;;  %v1685_v14 = vld [vmem:[#allocation5 + $0x68] ss:$16 sps:$4 sm:$0xff]   ;;  %s1479_s5 = sshll.u32 %s2078_s12, 5 }
  0x65   : > { %v378_v11 = vrot.slane %v376_v61, 1  ;;  %v1686_v15 = vld [vmem:[#allocation5 + $0x84] ss:$16 sps:$4 sm:$0xff]   ;;  %v1688_v16 = vld [vmem:[#allocation5 + $0x8c] ss:$16 sps:$4 sm:$0xff]   ;;  %v381_v17 = vshrl.u32 %v2131_v47, 16 }
  0x66   : > { %v2161_v63 = vrot.slane %v434_v56, %v2127_v46  ;;  %v552_v2 = vrot.slane %v409_v60, %v2127_v46  ;;  %991 = vmatpush1.bf16.msra.mxu0 %v1678_v1  ;;  %1077 = vmatpush1.bf16.msra.mxu1 %v1679_v3  ;;  %v385_v19 = vrot.slane %v383_v7, 1  ;;  %v390_v20 = vshll.u32 %v2153_v57, 16  ;;  %v1690_v21 = vld [vmem:[#allocation5 + $0x80] ss:$16 sps:$4 sm:$0xff]   ;;  %v1691_v23 = vld [vmem:[#allocation5 + $0x88] ss:$16 sps:$4 sm:$0xff]  }
  0x67   : > { %435 = vrot.lane.b32.xlu0 %v407_v52, %s1909_s23  ;;  %992 = vmatprep.subr.bf16.mxu0 %v1680_v8  ;;  %v2175_v18 = vor.u32 %v378_v11, %v374_v5  ;;  %v1692_v24 = vld [vmem:[#allocation5 + $0xa4] ss:$16 sps:$4 sm:$0xff]   ;;  %v1694_v25 = vld [vmem:[#allocation5 + $0xac] ss:$16 sps:$4 sm:$0xff]   ;;  %v388_v27 = vshrl.u32 %v2153_v57, 16  ;;  %v430_v49 = vshll.u32 %v2143_v53, 16 }
  0x68   : > { %v1483_v4 = vcombine.low %v2161_v63, %v2148_v55  ;;  %441 = vrot.lane.b32.xlu1 %v434_v56, %s1909_s23  ;;  %v2169_v9 = vcombine.low %v536_v59, %v552_v2  ;;  %1078 = vmatprep.subr.bf16.mxu1 %v1682_v12  ;;  %v2181_v26 = vor.u32 %v385_v19, %v381_v17  ;;  %v392_v28 = vrot.slane %v390_v20, 1  ;;  %v1696_v29 = vld [vmem:[#allocation5 + $0xa0] ss:$16 sps:$4 sm:$0xff]   ;;  %v1697_v30 = vld [vmem:[#allocation5 + $0xa8] ss:$16 sps:$4 sm:$0xff]   ;;  %s1580_s7 = sshll.u32 %s1960_s19, 9 }
  0x69   : > { %v1698_v31 = vld [vmem:[#allocation5 + $0xc4] ss:$16 sps:$4 sm:$0xff]   ;;  %v1700_v32 = vld [vmem:[#allocation5 + $0xcc] ss:$16 sps:$4 sm:$0xff]   ;;  %v1702_v34 = vld [vmem:[#allocation5 + $0xc0] ss:$16 sps:$4 sm:$0xff]   ;;  %s2291_s13 = scalar_lea.hbm %s2341_s4, %s1580_s7 }
  0x6a   : > { %993 = vmatpush1.bf16.msra.mxu0 %v1684_v13  ;;  %1079 = vmatpush1.bf16.msra.mxu1 %v1685_v14  ;;  %v2188_v33 = vor.u32 %v392_v28, %v388_v27  ;;  %v1703_v35 = vld [vmem:[#allocation5 + $0xc8] ss:$16 sps:$4 sm:$0xff]   ;;  %v1704_v36 = vld [vmem:[#allocation5 + $0xe4] ss:$16 sps:$4 sm:$0xff]   ;;  %v1706_v37 = vld [vmem:[#allocation5 + $0xec] ss:$16 sps:$4 sm:$0xff]   ;;  %v617_v7 = vrot.slane %v1483_v4, %v2127_v46  ;;  %v603_v8 = vrot.slane %v2169_v9, %v2127_v46 }
  0x6b   : > { %439 = vrot.lane.b32.xlu0 %v409_v60, %s1909_s23  ;;  %994 = vmatprep.subr.bf16.mxu0 %v1686_v15  ;;  %v1708_v38 = vld [vmem:[#allocation5 + $0xe0] ss:$16 sps:$4 sm:$0xff]   ;;  %v1709_v39 = vld [vmem:[#allocation5 + $0xe8] ss:$16 sps:$4 sm:$0xff]   ;;  %v1710_v40 = vld [vmem:[#allocation5 + $0x104] ss:$16 sps:$4 sm:$0xff]  }
  0x6c   : > { %412 = vrot.lane.b32.xlu1 %v407_v52, %s1908_s21  ;;  %1080 = vmatprep.subr.bf16.mxu1 %v1688_v16  ;;  %v1712_v41 = vld [vmem:[#allocation5 + $0x10c] ss:$16 sps:$4 sm:$0xff]   ;;  %v1714_v42 = vld [vmem:[#allocation5 + $0x100] ss:$16 sps:$4 sm:$0xff]   ;;  %v1715_v43 = vld [vmem:[#allocation5 + $0x108] ss:$16 sps:$4 sm:$0xff]   ;;  %v2222_v14 = vcombine.low %v603_v8, %v617_v7 }
  0x6d   : > { %v1716_v44 = vld [vmem:[#allocation5 + $0x124] ss:$16 sps:$4 sm:$0xff]   ;;  %v1718_v45 = vld [vmem:[#allocation5 + $0x12c] ss:$16 sps:$4 sm:$0xff]   ;;  %v1720_v50 = vld [vmem:[#allocation5 + $0x120] ss:$16 sps:$4 sm:$0xff]  }
  0x6e   : > { %995 = vmatpush1.bf16.msra.mxu0 %v1690_v21  ;;  %1081 = vmatpush1.bf16.msra.mxu1 %v1691_v23  ;;  %v1722_v52 = vld [vmem:[#allocation5 + $0x144] ss:$16 sps:$4 sm:$0xff]   ;;  %v1724_v54 = vld [vmem:[#allocation5 + $0x14c] ss:$16 sps:$4 sm:$0xff]   ;;  %v428_v56 = vshrl.u32 %v2143_v53, 16  ;;  %v432_v58 = vrot.slane %v430_v49, 1 }
  0x6f   : > { %414 = vrot.lane.b32.xlu0 %v408_v51, %s1908_s21  ;;  %996 = vmatprep.subr.bf16.mxu0 %v1692_v24  ;;  %v1721_v51 = vld [vmem:[#allocation5 + $0x128] ss:$16 sps:$4 sm:$0xff]   ;;  %v1726_v59 = vld [vmem:[#allocation5 + $0x140] ss:$16 sps:$4 sm:$0xff]   ;;  %v1728_v61 = vld [vmem:[#allocation5 + $0x164] ss:$16 sps:$4 sm:$0xff]  }
  0x70   : > { %416 = vrot.lane.b32.xlu1 %v409_v60, %s1908_s21  ;;  %1082 = vmatprep.subr.bf16.mxu1 %v1694_v25  ;;  %v1727_v60 = vld [vmem:[#allocation5 + $0x148] ss:$16 sps:$4 sm:$0xff]   ;;  %v1730_v62 = vld [vmem:[#allocation5 + $0x16c] ss:$16 sps:$4 sm:$0xff]   ;;  %v2212_v1 = vor.u32 %v432_v58, %v428_v56  ;;  %v1732_v2 = vld [vmem:[#allocation5 + $0x160] ss:$16 sps:$4 sm:$0xff]  }
  0x71   : > { %v1733_v3 = vld [vmem:[#allocation5 + $0x168] ss:$16 sps:$4 sm:$0xff]   ;;  %v1736_v5 = vld [vmem:[#allocation5 + $0x18c] ss:$16 sps:$4 sm:$0xff]   ;;  %v1740_v12 = vld [vmem:[#allocation5 + $0x1a4] ss:$16 sps:$4 sm:$0xff]  }
  0x72   : > { %997 = vmatpush1.bf16.msra.mxu0 %v1696_v29  ;;  %1083 = vmatpush1.bf16.msra.mxu1 %v1697_v30  ;;  %v1739_v11 = vld [vmem:[#allocation5 + $0x188] ss:$16 sps:$4 sm:$0xff]   ;;  %v1742_v13 = vld [vmem:[#allocation5 + $0x1ac] ss:$16 sps:$4 sm:$0xff]   ;;  %v1744_v55 = vld [vmem:[#allocation5 + $0x1a0] ss:$16 sps:$4 sm:$0xff]  }
  0x73   : > { %396 = vrot.lane.b32.xlu0 %v2175_v18, %s1909_s23  ;;  %998 = vmatprep.subr.bf16.mxu0 %v1698_v31  ;;  %v1745_v63 = vld [vmem:[#allocation5 + $0x1a8] ss:$16 sps:$4 sm:$0xff]   ;;  %v1746_v4 = vld [vmem:[#allocation5 + $0x1c4] ss:$16 sps:$4 sm:$0xff]   ;;  %v1748_v9 = vld [vmem:[#allocation5 + $0x1cc] ss:$16 sps:$4 sm:$0xff]  }
  0x74   : > { %398 = vrot.lane.b32.xlu1 %v2181_v26, %s1909_s23  ;;  %1084 = vmatprep.subr.bf16.mxu1 %v1700_v32  ;;  %v1750_v15 = vld [vmem:[#allocation5 + $0x1c0] ss:$16 sps:$4 sm:$0xff]   ;;  %v1751_v16 = vld [vmem:[#allocation5 + $0x1c8] ss:$16 sps:$4 sm:$0xff]   ;;  %v1752_v17 = vld [vmem:[#allocation5 + $0x1e4] ss:$16 sps:$4 sm:$0xff]  }
  0x75   : > { %v1754_v19 = vld [vmem:[#allocation5 + $0x1ec] ss:$16 sps:$4 sm:$0xff]   ;;  %v1756_v20 = vld [vmem:[#allocation5 + $0x1e0] ss:$16 sps:$4 sm:$0xff]   ;;  %v1757_v21 = vld [vmem:[#allocation5 + $0x1e8] ss:$16 sps:$4 sm:$0xff]  }
  0x76   : > { %999 = vmatpush1.bf16.msra.mxu0 %v1702_v34  ;;  %1085 = vmatpush1.bf16.msra.mxu1 %v1703_v35  ;;  %v1760_v23 = vld [vmem:[#allocation5 + $0x204] ss:$16 sps:$4 sm:$0xff]   ;;  %v1763_v24 = vld [vmem:[#allocation5 + $0x20c] ss:$16 sps:$4 sm:$0xff]   ;;  %vm459_vm6 = vcmask 261120   ;;  %vm468_vm7 = vcmask 523264  }
  0x77   : > { %443 = vrot.lane.b32.xlu0 %v2131_v47, %s1908_s21  ;;  %1000 = vmatprep.subr.bf16.mxu0 %v1704_v36  ;;  %vm477_vm8 = vcmask 785408   ;;  %s230_s26 = scalar_lea.vmem [#allocation7], %s1479_s5  ;;  %s1373_s19 = scalar_lea.sflag [#allocation4], %s2078_s12 }
  0x78   : > { %400 = vrot.lane.b32.xlu1 %v2188_v33, %s1909_s23  ;;  %1086 = vmatprep.subr.bf16.mxu1 %v1706_v37  ;;  %s1386_s8 = sshll.u32 %s230_s26, 4  ;;  %s1911_s20 = smov [#allocation7]   ;;  %s2293_s8 = int_to_ptr.vmem [resolvable:$true] %s1386_s8 }
  0x79   : > { %s1828_s14 = scalar_lea.vmem %s2293_s8, 512 }
  0x7a   : > { %1001 = vmatpush1.bf16.msra.mxu0 %v1708_v38  ;;  %1087 = vmatpush1.bf16.msra.mxu1 %v1709_v39  ;;  %p1829_p4 = scmp.ne.s32.totalorder %s2293_s8, %s1828_s14 }
  0x7b   : > { %447 = vrot.lane.b32.xlu0 %v2143_v53, %s1908_s21  ;;  %1002 = vmatprep.subr.bf16.mxu0 %v1710_v40 }
  0x7c   : > { %445 = vrot.lane.b32.xlu1 %v2153_v57, %s1908_s21  ;;  %1088 = vmatprep.subr.bf16.mxu1 %v1712_v41  ;;  %p1830_p6 = pnand %p1829_p4, %p2030_p12  ;;  %s1832_s21 = sshll.u32 %s1911_s20, 4  ;;  %s1833_s21 = int_to_ptr.vmem [resolvable:$false] %s1832_s21 }
  0x7d   : > { %s1834_s23 = scalar_lea.vmem %s1833_s21, 1024  ;;  %p1835_p10 = scmp.lt.s32.totalorder %s2293_s8, %s1833_s21 }
  0x7e   : > { %1003 = vmatpush1.bf16.msra.mxu0 %v1714_v42  ;;  %1089 = vmatpush1.bf16.msra.mxu1 %v1715_v43  ;;  %p1831_p8 = pneg %p1830_p6  ;;  %p1836_p13 = scmp.lt.s32.totalorder %s1834_s23, %s1828_s14 }
  0x7f   : > { %421 = vrot.lane.b32.xlu0 %v2131_v47, %s1910_s9  ;;  %1004 = vmatprep.subr.bf16.mxu0 %v1716_v44 }
  0x80   : > { %419 = vrot.lane.b32.xlu1 %v2135_v48, %s1910_s9  ;;  %1090 = vmatprep.subr.bf16.mxu1 %v1718_v45  ;;  %p1837_p3 = por %p1836_p13, %p1835_p10 }
  0x82   : > { %1005 = vmatpush1.bf16.msra.mxu0 %v1720_v50  ;;  %1091 = vmatpush1.bf16.msra.mxu1 %v1721_v51  ;;  %p1838_p7 = pnand %p1837_p3, %p1831_p8 }
  0x83   : > { %425 = vrot.lane.b32.xlu0 %v2143_v53, %s1910_s9  ;;  %1006 = vmatprep.subr.bf16.mxu0 %v1722_v52  ;;  %v1734_v53 = vld [vmem:[#allocation5 + $0x184] ss:$16 sps:$4 sm:$0xff]  }
  0x84   : > { %423 = vrot.lane.b32.xlu1 %v2153_v57, %s1910_s9  ;;  %1092 = vmatprep.subr.bf16.mxu1 %v1724_v54 }
  0x86   : > { %1007 = vmatpush1.bf16.msra.mxu0 %v1726_v59  ;;  %1093 = vmatpush1.bf16.msra.mxu1 %v1727_v60 }
  0x87   : > { %453 = vrot.lane.b32.xlu0 %v2188_v33, %s1910_s9  ;;  %1008 = vmatprep.subr.bf16.mxu0 %v1728_v61 }
  0x88   : > { %451 = vrot.lane.b32.xlu1 %v2181_v26, %s1910_s9  ;;  %1094 = vmatprep.subr.bf16.mxu1 %v1730_v62 }
  0x8a   : > { %1009 = vmatpush1.bf16.msra.mxu0 %v1732_v2  ;;  %1095 = vmatpush1.bf16.msra.mxu1 %v1733_v3 }
  0x8b   : > { %457 = vrot.lane.b32.xlu0 %v2117_v22, %s1910_s9  ;;  %v1738_v22 = vld [vmem:[#allocation5 + $0x180] ss:$16 sps:$4 sm:$0xff]   ;;  %1010 = vmatprep.subr.bf16.mxu0 %v1734_v53 }
  0x8c   : > { %455 = vrot.lane.b32.xlu1 %v2212_v1, %s1910_s9  ;;  %1096 = vmatprep.subr.bf16.mxu1 %v1736_v5 }
  0x8e   : > { %1011 = vmatpush1.bf16.msra.mxu0 %v1738_v22  ;;  %1097 = vmatpush1.bf16.msra.mxu1 %v1739_v11 }
  0x8f   : > { %1012 = vmatprep.subr.bf16.mxu0 %v1740_v12  ;;  %1098 = vmatprep.subr.bf16.mxu1 %v1742_v13 }
  0x92   : > { %1013 = vmatpush1.bf16.msra.mxu0 %v1744_v55  ;;  %1099 = vmatpush1.bf16.msra.mxu1 %v1745_v63 }
  0x93   : > { %1014 = vmatprep.subr.bf16.mxu0 %v1746_v4  ;;  %1100 = vmatprep.subr.bf16.mxu1 %v1748_v9 }
  0x96   : > { %1015 = vmatpush1.bf16.msra.mxu0 %v1750_v15  ;;  %1101 = vmatpush1.bf16.msra.mxu1 %v1751_v16 }
  0x97   : > { %1016 = vmatprep.subr.bf16.mxu0 %v1752_v17  ;;  %1102 = vmatprep.subr.bf16.mxu1 %v1754_v19 }
  0x9a   : > { %1017 = vmatpush1.bf16.msra.mxu0 %v1756_v20  ;;  %1103 = vmatpush1.bf16.msra.mxu1 %v1757_v21 }
  0x9b   : > { %1029 = vmatprep.subr.bf16.mxu0 %v1760_v23  ;;  %1115 = vmatprep.subr.bf16.mxu1 %v1763_v24 }
  0xd1   : > { %v1659_v25 = vpop.permute.xlu0 %1658 }
  0xd2   : > { %v1660_v45 = vunpack.i.l.bf16 %v1659_v25  ;;  %v1661_v58 = vunpack.i.h.bf16 %v1659_v25 }
  0xd5   : > { %v395_v27 = vpop.permute.xlu0 %394 }
  0xd6   : > { %v438_v28 = vpop.permute.xlu1 %437  ;;  %v461_v49 = vsel %vm459_vm6, %v2105_v6, %v395_v27 }
  0xd7   : > { %v491_v52 = vsel %vm459_vm6, %v2181_v26, %v438_v28  ;;  %v470_v61 = vsel %vm468_vm7, %v461_v49, %v1660_v45  ;;  %v1758_v28 = vld [vmem:[#allocation5 + $0x200] ss:$16 sps:$4 sm:$0xff]  }
  0xd9   : > { %v436_v29 = vpop.permute.xlu0 %435 }
  0xda   : > { %v442_v30 = vpop.permute.xlu1 %441  ;;  %v488_v60 = vsel %vm459_vm6, %v2175_v18, %v436_v29  ;;  %v1761_v29 = vld [vmem:[#allocation5 + $0x208] ss:$16 sps:$4 sm:$0xff]  }
  0xdb   : > { %v497_v54 = vsel %vm459_vm6, %v2212_v1, %v442_v30 }
  0xdc   : > { %v505_v3 = vsel %vm468_vm7, %v497_v54, %v1661_v58 }
  0xdd   : > { %v440_v31 = vpop.permute.xlu0 %439 }
  0xde   : > { %v413_v32 = vpop.permute.xlu1 %412  ;;  %v494_v11 = vsel %vm459_vm6, %v2188_v33, %v440_v31  ;;  %v1766_v31 = vld [vmem:[#allocation5 + $0x224] ss:$16 sps:$4 sm:$0xff]  }
  0xe1   : > { %v415_v34 = vpop.permute.xlu0 %414 }
  0xe2   : > { %v417_v35 = vpop.permute.xlu1 %416 }
  0xe5   : > { %v397_v36 = vpop.permute.xlu0 %396 }
  0xe6   : > { %v399_v37 = vpop.permute.xlu1 %398  ;;  %v463_v56 = vsel %vm459_vm6, %v2135_v48, %v397_v36  ;;  %v1161_v36 = vsub.s32 0, %v2110_v10 }
  0xe7   : > { %v465_v62 = vsel %vm459_vm6, %v2131_v47, %v399_v37  ;;  %v472_v48 = vsel %vm468_vm7, %v463_v56, %v413_v32  ;;  %v1769_v32 = vld [vmem:[#allocation5 + $0x22c] ss:$16 sps:$4 sm:$0xff]   ;;  %v1169_v37 = vsub.s32 2, %v2110_v10 }
  0xe8   : > { %v474_v55 = vsel %vm468_vm7, %v465_v62, %v415_v34  ;;  %v1764_v34 = vld [vmem:[#allocation5 + $0x220] ss:$16 sps:$4 sm:$0xff]  }
  0xe9   : > { %v444_v38 = vpop.permute.xlu0 %443 }
  0xea   : > { %v401_v39 = vpop.permute.xlu1 %400  ;;  %v499_v1 = vsel %vm468_vm7, %v488_v60, %v444_v38  ;;  %v308_v38 = vld [vmem:[%s2339_s2] sm:$0xf] }
  0xeb   : > { %v467_v6 = vsel %vm459_vm6, %v2153_v57, %v401_v39  ;;  %v1165_v39 = vsub.s32 1, %v2110_v10 }
  0xec   : > { %v476_v8 = vsel %vm468_vm7, %v467_v6, %v417_v35  ;;  %v1767_v35 = vld [vmem:[#allocation5 + $0x228] ss:$16 sps:$4 sm:$0xff]  }
  0xed   : > { %v448_v40 = vpop.permute.xlu0 %447 }
  0xee   : > { %v446_v41 = vpop.permute.xlu1 %445  ;;  %v503_v13 = vsel %vm468_vm7, %v494_v11, %v448_v40  ;;  %v309_v40 = vld [vmem:[%s2340_s3] sm:$0xf] }
  0xef   : > { %v501_v59 = vsel %vm468_vm7, %v491_v52, %v446_v41  ;;  %v1162_v41 = vrot.slane %v308_v38, %v1161_v36  ;;  %v1199_v45 = vrot.slane %v309_v40, %v1169_v37 }
  0xf1   : > { %v422_v42 = vpop.permute.xlu0 %421 }
  0xf2   : > { %v420_v43 = vpop.permute.xlu1 %419  ;;  %v481_v18 = vsel %vm477_vm8, %v472_v48, %v422_v42  ;;  %v1170_v42 = vrot.slane %v308_v38, %v1169_v37 }
  0xf3   : > { %v479_v5 = vsel %vm477_vm8, %v470_v61, %v420_v43  ;;  %v1166_v43 = vrot.slane %v308_v38, %v1165_v39 }
  0xf5   : > { %v426_v44 = vpop.permute.xlu0 %425 }
  0xf6   : > { %v424_v50 = vpop.permute.xlu1 %423  ;;  %v485_v12 = vsel %vm477_vm8, %v476_v8, %v426_v44  ;;  %v1191_v44 = vrot.slane %v309_v40, %v1161_v36 }
  0xf7   : > { %v483_v15 = vsel %vm477_vm8, %v474_v55, %v424_v50 }
  0xf9   : > { %v454_v51 = vpop.permute.xlu0 %453 }
  0xfa   : > { %v509_v26 = vsel %vm477_vm8, %v501_v59, %v454_v51  ;;  %v452_v2 = vpop.permute.xlu1 %451  ;;  %v1195_v51 = vrot.slane %v309_v40, %v1165_v39 }
  0xfb   : > { %v507_v57 = vsel %vm477_vm8, %v499_v1, %v452_v2  ;;  %v538_v22 = vcombine.low %v481_v18, %v509_v26 }
  0xfc   : > { %v522_v47 = vcombine.low %v479_v5, %v507_v57 }
  0xfd   : > { %v458_v53 = vpop.permute.xlu0 %457  ;;  %v545_v17 = vrot.slane %v538_v22, %v2127_v46 }
  0xfe   : > { %v513_v7 = vsel %vm477_vm8, %v505_v3, %v458_v53  ;;  %v529_v63 = vrot.slane %v522_v47, %v2127_v46  ;;  %v456_v9 = vpop.permute.xlu1 %455 }
  0xff   : > { %v570_v4 = vcombine.low %v485_v12, %v513_v7  ;;  %v511_v16 = vsel %vm477_vm8, %v503_v13, %v456_v9 }
 0x100   : > { %v554_v19 = vcombine.low %v483_v15, %v511_v16  ;;  %v1480_v21 = vcombine.low %v529_v63, %v545_v17 }
 0x101   : > { %v577_v20 = vrot.slane %v570_v4, %v2127_v46 }
 0x102   : > { %v561_v33 = vrot.slane %v554_v19, %v2127_v46  ;;  %v596_v24 = vrot.slane %v1480_v21, %v2127_v46 }
 0x104   : > { %v1482_v23 = vcombine.low %v561_v33, %v577_v20 }
 0x106   : > { %v610_v25 = vrot.slane %v1482_v23, %v2127_v46 }
 0x108   : > { %v619_v27 = vcombine.high %v596_v24, %v610_v25  ;;  %v618_v30 = vcombine.low %v596_v24, %v610_v25 }
 0x10a   : > { %1018 = vmatprep.mubr.bf16.mxu0 %v619_v27  ;;  %1104 = vmatprep.mubr.bf16.mxu1 %v619_v27 }
 0x10b   : > { %1019 = vmatmul.mubr.bf16.vlgmr.msra.gmra.mrb[0].mxu0 %v618_v30  ;;  %1105 = vmatmul.mubr.bf16.vlgmr.msra.gmra.mrb[0].mxu1 %v618_v30 }
 0x10c   : > { %1030 = vmatpush1.bf16.msra.mxu0 %v1758_v28  ;;  %1116 = vmatpush1.bf16.msra.mxu1 %v1761_v29 }
 0x10d   : > { %1031 = vmatprep.subr.bf16.mxu0 %v1766_v31  ;;  %1117 = vmatprep.subr.bf16.mxu1 %v1769_v32 }
 0x10e   : > { %1061 = vmatprep.mubr.bf16.mxu0 %v1906_v0  ;;  %1147 = vmatprep.mubr.bf16.mxu1 %v1906_v0  ;;  %v1173_v0 = vsub.s32 3, %v2110_v10 }
 0x110   : > { %1032 = vmatpush1.bf16.msra.mxu0 %v1764_v34  ;;  %1118 = vmatpush1.bf16.msra.mxu1 %v1767_v35  ;;  %v1203_v52 = vrot.slane %v309_v40, %v1173_v0 }
 0x117   : > { %1556 = vmatmul.mubr.msk.bf16.vlgmr.msra.gmra.mrb[0].mxu0 %vm459_vm6, %v2222_v14  ;;  %1557 = vmatmul.mubr.msk.bf16.vlgmr.msra.gmra.mrb[0].mxu1 %vm459_vm6, %v2222_v14  ;;  %v1174_v14 = vrot.slane %v308_v38, %v1173_v0 }
 0x1ea   : > { %v1063_v49 = vpop.f32.mrb[0].mxu0  ;;  %v1149_v50 = vpop.f32.mrb[0].mxu1 }
 0x1eb   : > { %v1179_v54 = vmul.f32 %v1162_v41, %v1063_v49  ;;  %v1181_v56 = vmul.f32 %v1170_v42, %v1149_v50  ;;  %v1065_v58 = vpop.f32.mrb[1].mxu0  ;;  %v1151_v59 = vpop.f32.mrb[1].mxu1 }
 0x1ec   : > { %v1180_v60 = vmul.f32 %v1166_v43, %v1065_v58  ;;  %v1182_v10 = vmul.f32 %v1174_v14, %v1151_v59  ;;  %v1067_v6 = vpop.f32.mrb[2].mxu0  ;;  %v1153_v61 = vpop.f32.mrb[2].mxu1 }
 0x1ed   : > { %v1208_v26 = vadd.f32 %v1191_v44, %v1179_v54  ;;  %v1210_v62 = vadd.f32 %v1199_v45, %v1181_v56  ;;  %v1183_v1 = vmul.f32 %v1162_v41, %v1067_v6  ;;  %v1185_v48 = vmul.f32 %v1170_v42, %v1153_v61  ;;  %v1069_v2 = vpop.f32.mrb[3].mxu0  ;;  %v1155_v3 = vpop.f32.mrb[3].mxu1 }
 0x1ee   : > { %v1209_v53 = vadd.f32 %v1195_v51, %v1180_v60  ;;  %v1211_v18 = vadd.f32 %v1203_v52, %v1182_v10  ;;  %v1184_v5 = vmul.f32 %v1166_v43, %v1069_v2  ;;  %v1186_v57 = vmul.f32 %v1174_v14, %v1155_v3 }
 0x1ef   : > { %v1216_v7 = vmax.f32 %v1208_v26, 0.0  ;;  %v1218_v8 = vmax.f32 %v1210_v62, 0.0  ;;  %v1212_v22 = vadd.f32 %v1191_v44, %v1183_v1  ;;  %v1214_v47 = vadd.f32 %v1199_v45, %v1185_v48 }
 0x1f0   : > { %v1217_v11 = vmax.f32 %v1209_v53, 0.0  ;;  %v1219_v12 = vmax.f32 %v1211_v18, 0.0  ;;  %v1213_v13 = vadd.f32 %v1195_v51, %v1184_v5  ;;  %v1215_v55 = vadd.f32 %v1203_v52, %v1186_v57 }
 0x1f1   : > { %v1220_v63 = vmax.f32 %v1212_v22, 0.0  ;;  %v1222_v4 = vmax.f32 %v1214_v47, 0.0 }
 0x1f2   : > { %v1232_v9 = vcombine.low %v1216_v7, %v1217_v11  ;;  %v1233_v15 = vcombine.high %v1216_v7, %v1217_v11  ;;  %v1558_v16 = vcombine.low %v1217_v11, %v1217_v11  ;;  %v1560_v17 = vcombine.high %v1217_v11, %v1217_v11 }
 0x1f3   : > { %v1234_v19 = vcombine.low %v1218_v8, %v1219_v12  ;;  %v1235_v20 = vcombine.high %v1218_v8, %v1219_v12  ;;  %v1559_v33 = vcombine.low %v1219_v12, %v1219_v12  ;;  %v1561_v21 = vcombine.high %v1219_v12, %v1219_v12 }
 0x1f4   : > { %v1566_v23 = vpack.c.bf16 %v1558_v16, %v1232_v9  ;;  %v1568_v24 = vpack.c.bf16 %v1560_v17, %v1233_v15  ;;  %v1221_v25 = vmax.f32 %v1213_v13, 0.0  ;;  %v1223_v27 = vmax.f32 %v1215_v55, 0.0 }
 0x1f5   : > { %v1567_v28 = vpack.c.bf16 %v1559_v33, %v1234_v19  ;;  %v1569_v29 = vpack.c.bf16 %v1561_v21, %v1235_v20 }
 0x1f6   : > { %v1304_v30 = vrot.slane %v1566_v23, %v2127_v46  ;;  %v1321_v31 = vrot.slane %v1568_v24, %v2127_v46  ;;  %v1236_v32 = vcombine.low %v1220_v63, %v1221_v25  ;;  %v1237_v34 = vcombine.high %v1220_v63, %v1221_v25 }
 0x1f7   : > { %v1311_v35 = vrot.slane %v1567_v28, %v2127_v46  ;;  %v1328_v36 = vrot.slane %v1569_v29, %v2127_v46  ;;  %v1562_v37 = vcombine.low %v1221_v25, %v1221_v25  ;;  %v1564_v38 = vcombine.high %v1221_v25, %v1221_v25 }
 0x1f8   : > { %v1238_v39 = vcombine.low %v1222_v4, %v1223_v27  ;;  %v1239_v0 = vcombine.high %v1222_v4, %v1223_v27  ;;  %v1563_v40 = vcombine.low %v1223_v27, %v1223_v27  ;;  %v1565_v41 = vcombine.high %v1223_v27, %v1223_v27 }
 0x1f9   : > { %v1312_v42 = vcombine.low %v1304_v30, %v1311_v35  ;;  %v1329_v43 = vcombine.low %v1321_v31, %v1328_v36  ;;  %v1570_v14 = vpack.c.bf16 %v1562_v37, %v1236_v32  ;;  %v1572_v44 = vpack.c.bf16 %v1564_v38, %v1237_v34 }
 0x1fa   : > { %v1571_v45 = vpack.c.bf16 %v1563_v40, %v1238_v39  ;;  %v1573_v49 = vpack.c.bf16 %v1565_v41, %v1239_v0 }
 0x1fb   : > { %1368 = vst [vmem:[%s230_s26] sm:$0xff] %v1312_v42  ;;  %1369 = vst [vmem:[%s230_s26 + $0x8] sm:$0xff] %v1329_v43  ;;  %v1338_v50 = vrot.slane %v1570_v14, %v2127_v46  ;;  %v1355_v51 = vrot.slane %v1572_v44, %v2127_v46 }
 0x1fc   : > { %v1345_v52 = vrot.slane %v1571_v45, %v2127_v46  ;;  %v1362_v54 = vrot.slane %v1573_v49, %v2127_v46 }
 0x1fe   : > { %v1346_v56 = vcombine.low %v1338_v50, %v1345_v52  ;;  %v1363_v58 = vcombine.low %v1355_v51, %v1362_v54 }
 0x200   : > { %1370 = vst [vmem:[%s230_s26 + $0x10] sm:$0xff] %v1346_v56  ;;  %1371 = vst [vmem:[%s230_s26 + $0x18] sm:$0xff] %v1363_v58 }
 0x201   : > { %1841 = shalt.err (!%p1838_p7)
}
 0x202   : > { %s1842_s9 = scalar_lea.hbm %s2291_s13, 512  ;;  %s1846_s10 = scalar_lea.hbm %s2341_s4, 1024 }
 0x203   : > { %p1843_p9 = scmp.ne.s32.totalorder %s2291_s13, %s1842_s9  ;;  %p1847_p5 = scmp.lt.u32.totalorder %s2291_s13, %s2341_s4 }
 0x204   : > { %p1848_p11 = scmp.lt.u32.totalorder %s1846_s10, %s1842_s9  ;;  %p1850_p4 = scmp.lt.u32.totalorder %s1842_s9, %s2291_s13 }
 0x205   : > { %p1844_p2 = pnand %p1843_p9, %p2030_p12 }
 0x206   : > { %p1849_p1 = por %p1848_p11, %p1847_p5 }
 0x207   : > { %p1845_p0 = pneg %p1844_p2 }
 0x208   : > { %p1851_p6 = por %p1850_p4, %p1849_p1 }
 0x20a   : > { %p1852_p8 = pnand %p1851_p6, %p1845_p0 }
 0x20c   : > { %1855 = shalt.err (!%p1852_p8)
}
 0x20d   : > { %s1912_s7 = smov 128   ;;  %s1913_s26 = smov 8  }
 0x20e   : > { %1595 = dma.vmem_to_hbm [thread:$0]  (%p2030_p12), %s2293_s8, 512, %s2291_s13, %s1373_s19, %s1912_s7, %s1912_s7, %s1913_s26  }
 0x20f PF: > { %s1401_s25 = sand.u32 1, %s1886_s15   ;;  %p2360_p10 = scmp.ne.s32.totalorder %s2346_s22, 0 }
 0x210   : > { %p2361_p13 = scmp.ge.s32.totalorder %s1898_s18, 2  ;;  %s1402_s11 = scalar_lea.sflag [#allocation4], %s1401_s25 }
 0x212   : > { %p1606_p3 = pnand %p2361_p13, %p2360_p10 }
 0x214   : > { %1881 = dma.done.wait (!%p1606_p3), %s1402_s11, 512  }
 0x215   : > { %1883 = vsyncadd (!%p1606_p3), %s1402_s11, 4294966784  ;;  %p18_p7 = scmp.ge.s32.totalorder %s1995_s27, 4   ;;  %s2362_s15 = smov %s1890_s16 }
 0x216   : > { %s2363_s16 = smov %s1894_s17  ;;  %s2364_s17 = smov %s2026_s24 }
 0x217   : > { %s2365_s18 = smov %s1995_s27  ;;  %20 = sbr.rel (!%p18_p7) target bundleno = 6 (0x6), region = 85 }
 0x21e   :  { %1407 = vsyncpa [#allocation3], 1 }
 0x21f   :  { %1409 = vsyncpa [#allocation3 + $0x1], 1 }
 0x220   :  { %1410 = vsyncpa [#allocation6], 1 }
 0x221   :  { %1411 = vsyncpa [#allocation4], 1 }
 0x222   :  { %1413 = vsyncpa [#allocation4 + $0x1], 1 }

</bundles_post_ra>
